<compile_context>
chip_gen: v7x
topology: tpu7x:2x2x1
jax: 0.10.0
libtpu: 0.0.40
codegen_flags: <defaults>
</compile_context>

<pallas_src>
import jax
import jax.numpy as jnp
from jax import lax
from jax.experimental import pallas as pl
from jax.experimental.pallas import tpu as pltpu

# ---------------- model hyper-parameters (mirroring RecNet.__init__) ----------
ALPHA = 100.0        # DWMTJParameters alpha
HLEAK = 0.0          # DWMTJParameters H (leak field) -- zero, folded out below
W2 = 2.5e-08         # DWMTJParameters w2  -> wall-position firing threshold
I_DRIVE = 1e-4       # DWMTJParameters I   (drive current scale, folded into weight init)
DT = 1e-10           # integration step

# norse LICell default parameters
TAU_SYN_INV = 1.0 / 5e-3
TAU_MEM_INV = 1.0 / 1e-2
V_LEAK = 0.0

# pre-folded per-step scalars
DT_ALPHA = DT * ALPHA                 # pos drive gain   (HLEAK == 0 -> no leak term)
DT_TAUMEM = DT * TAU_MEM_INV          # LI membrane update gain
SYN_DECAY = 1.0 - DT * TAU_SYN_INV    # LI synaptic-current decay

assert HLEAK == 0.0, "kernel folds out the HLEAK*pos term; only valid for HLEAK == 0"
assert W2 > 0.0, "zero-padded hidden lanes must never reach the spike threshold"


def _round_up(n, m):
    return ((n + m - 1) // m) * m


def _recnet_kernel(x_ref, w_in_ref, w_rec_ref, w_out_ref, v_ref,
                   spk_ref, pos_ref, vst_ref, ist_ref,
                   drive_ref, spkseq_ref, outcur_ref):
    """One T_BLK-step block of the recurrence; state carried in VMEM scratch."""
    t_blk, B, f_in = x_ref.shape
    hid = w_rec_ref.shape[0]
    f_out = w_out_ref.shape[1]

    # Initialize the carried recurrent state once, on the first time block.
    @pl.when(pl.program_id(0) == 0)
    def _():
        spk_ref[...] = jnp.zeros_like(spk_ref)
        pos_ref[...] = jnp.zeros_like(pos_ref)
        vst_ref[...] = jnp.zeros_like(vst_ref)
        ist_ref[...] = jnp.zeros_like(ist_ref)

    # ---- Hoisted non-recurrent input matmul: one batched MXU call per block.
    drive_ref[...] = jnp.dot(
        x_ref[...].reshape(t_blk * B, f_in), w_in_ref[...],
        preferred_element_type=jnp.float32).reshape(t_blk, B, hid)

    # ---- Serial DWMTJ spiking recurrence; only spk @ W_rec on critical path.
    # TODO(synk): exact dwmtjrec.DWMTJRecurrentCell dynamics are from a private
    # library; approximated as a current-driven domain-wall position integrator
    # with threshold firing ('super' only changes gradients, not the forward).
    def rec_step(t, carry):
        spk, pos = carry
        cur = drive_ref[t] + jnp.dot(spk, w_rec_ref[...],
                                     preferred_element_type=jnp.float32)
        pos_new = pos + DT_ALPHA * cur            # HLEAK == 0 folded out
        spk_new = (pos_new >= W2).astype(jnp.float32)
        pos_new = pos_new - spk_new * W2          # reset-by-subtraction
        spkseq_ref[t] = spk_new
        return spk_new, pos_new

    spk, pos = lax.fori_loop(0, t_blk, rec_step,
                             (spk_ref[...], pos_ref[...]), unroll=True)
    spk_ref[...] = spk
    pos_ref[...] = pos

    # ---- Deferred fc_out readout: one batched MXU matmul for the block.
    outcur_ref[...] = jnp.dot(
        spkseq_ref[...].reshape(t_blk * B, hid), w_out_ref[...],
        preferred_element_type=jnp.float32).reshape(t_blk, B, f_out)

    # ---- LICell leaky integrator: VPU-only scan, lane-dense per-step stores.
    def li_step(t, carry):
        v, i = carry
        v_new = v + DT_TAUMEM * ((V_LEAK - v) + i)
        i_new = i * SYN_DECAY + outcur_ref[t]
        v_ref[t] = v_new
        return v_new, i_new

    v, i = lax.fori_loop(0, t_blk, li_step,
                         (vst_ref[...], ist_ref[...]), unroll=True)
    vst_ref[...] = v
    ist_ref[...] = i


def recnet_forward(x, w_in, w_rec, w_out, *, t_blk=4):
    """x: (T, B, C, H, W) float32.  Returns voltages (T, B, output_features)."""
    T, B = x.shape[0], x.shape[1]
    f_in = x.shape[2] * x.shape[3] * x.shape[4]
    hid = w_in.shape[1]
    f_out = w_out.shape[1]
    assert w_in.shape == (f_in, hid)
    assert w_rec.shape == (hid, hid)
    assert w_out.shape == (hid, f_out)

    # Pad to hardware tiles: batch -> multiple of 8 sublanes (f32),
    # feature dims -> multiples of 128 lanes, time -> multiple of t_blk.
    # Zero padding is exact: padded lanes never spike (W2 > 0) and padded
    # rows/cols of the weights contribute nothing.
    B_p = _round_up(max(B, 8), 8)
    f_in_p = _round_up(f_in, 128)
    hid_p = _round_up(hid, 128)
    f_out_p = _round_up(f_out, 128)
    t_blk = min(t_blk, T)
    T_p = _round_up(T, t_blk)
    n_blocks = T_p // t_blk

    x_flat = x.reshape(T, B, f_in).astype(jnp.float32)
    x_pad = jnp.zeros((T_p, B_p, f_in_p), jnp.float32).at[:T, :B, :f_in].set(x_flat)
    w_in_p = jnp.zeros((f_in_p, hid_p), jnp.float32).at[:f_in, :hid].set(w_in)
    w_rec_p = jnp.zeros((hid_p, hid_p), jnp.float32).at[:hid, :hid].set(w_rec)
    w_out_p = jnp.zeros((hid_p, f_out_p), jnp.float32).at[:hid, :f_out].set(w_out)

    # Advisory cost estimate for XLA scheduling around the custom call.
    flops = 2 * T_p * B_p * (f_in_p * hid_p + hid_p * hid_p + hid_p * f_out_p)
    bytes_accessed = 4 * (x_pad.size + w_in_p.size + w_rec_p.size + w_out_p.size
                          + T_p * B_p * f_out_p)
    cost = pl.CostEstimate(flops=flops, transcendentals=0,
                           bytes_accessed=bytes_accessed)

    # VMEM budget: double-buffered x/out blocks + weights + state/block scratch.
    vmem_bytes = 4 * (
        2 * t_blk * B_p * f_in_p                                   # x block x2
        + 2 * t_blk * B_p * f_out_p                                # v block x2
        + 2 * (f_in_p * hid_p + hid_p * hid_p + hid_p * f_out_p)   # weights x2
        + 2 * (B_p * hid_p + B_p * f_out_p)                        # carried state
        + 2 * t_blk * B_p * hid_p + t_blk * B_p * f_out_p)         # block scratch
    vmem_limit = int(min(max(2 * vmem_bytes, 8 << 20), 64 << 20))

    grid_spec = pltpu.PrefetchScalarGridSpec(
        num_scalar_prefetch=0,
        grid=(n_blocks,),
        in_specs=[
            pl.BlockSpec((t_blk, B_p, f_in_p), lambda tb: (tb, 0, 0)),  # x block
            pl.BlockSpec((f_in_p, hid_p), lambda tb: (0, 0)),           # W_in
            pl.BlockSpec((hid_p, hid_p), lambda tb: (0, 0)),            # W_rec
            pl.BlockSpec((hid_p, f_out_p), lambda tb: (0, 0)),          # W_out
        ],
        out_specs=pl.BlockSpec((t_blk, B_p, f_out_p), lambda tb: (tb, 0, 0)),
        scratch_shapes=[
            pltpu.VMEM((B_p, hid_p), jnp.float32),         # spk state (carried)
            pltpu.VMEM((B_p, hid_p), jnp.float32),         # pos state (carried)
            pltpu.VMEM((B_p, f_out_p), jnp.float32),       # LI membrane v (carried)
            pltpu.VMEM((B_p, f_out_p), jnp.float32),       # LI syn current i (carried)
            pltpu.VMEM((t_blk, B_p, hid_p), jnp.float32),  # drive = x @ W_in
            pltpu.VMEM((t_blk, B_p, hid_p), jnp.float32),  # spike block
            pltpu.VMEM((t_blk, B_p, f_out_p), jnp.float32),  # out_cur block
        ],
    )

    out_pad = pl.pallas_call(
        _recnet_kernel,
        out_shape=jax.ShapeDtypeStruct((T_p, B_p, f_out_p), jnp.float32),
        grid_spec=grid_spec,
        compiler_params=pltpu.CompilerParams(
            dimension_semantics=("arbitrary",),   # state carried across time blocks
            vmem_limit_bytes=vmem_limit),
        cost_estimate=cost,
    )(x_pad, w_in_p, w_rec_p, w_out_p)

    return out_pad[:T, :B, :f_out]


def recnet_reference(x, w_in, w_rec, w_out):
    """Pure-JAX reference with identical (unfused, unpadded) math."""
    T, B = x.shape[0], x.shape[1]
    f_in = w_in.shape[0]
    z_seq = x.reshape(T, B, f_in).astype(jnp.float32)
    spk = jnp.zeros((B, w_in.shape[1]), jnp.float32)
    pos = jnp.zeros_like(spk)
    v = jnp.zeros((B, w_out.shape[1]), jnp.float32)
    i = jnp.zeros_like(v)
    outs = []
    for t in range(T):
        cur = z_seq[t] @ w_in + spk @ w_rec
        pos = pos + DT * (ALPHA * cur - HLEAK * pos)
        spk = (pos >= W2).astype(jnp.float32)
        pos = pos - spk * W2
        oc = spk @ w_out
        v = v + DT * TAU_MEM_INV * ((V_LEAK - v) + i)
        i = i * (1.0 - DT * TAU_SYN_INV) + oc
        outs.append(v)
    return jnp.stack(outs)


def init_params(key, input_features, hidden_features, output_features):
    """Deterministic init, matching torch Linear-style uniform(-1/sqrt(fan_in), +)."""
    k1, k2, k3 = jax.random.split(key, 3)
    b_in = 1.0 / jnp.sqrt(input_features)
    b_hid = 1.0 / jnp.sqrt(hidden_features)
    # Stored as (in, out) so the kernel computes z @ W (torch stores (out, in)).
    w_in = jax.random.uniform(k1, (input_features, hidden_features),
                              jnp.float32, -b_in, b_in) * I_DRIVE
    w_rec = jax.random.uniform(k2, (hidden_features, hidden_features),
                               jnp.float32, -b_hid, b_hid) * I_DRIVE
    w_out = jax.random.uniform(k3, (hidden_features, output_features),
                               jnp.float32, -b_hid, b_hid)
    return w_in, w_rec, w_out


if __name__ == "__main__":
    # Small shapes consistent with the forward: x is (seq, batch, C, H, W) and
    # C*H*W == input_features.  t_blk=4 gives a 2-step grid, exercising the
    # cross-block state carry.
    T, B, C, H, W = 8, 2, 4, 4, 4
    input_features = C * H * W          # 64
    hidden_features = 32
    output_features = 16

    key = jax.random.PRNGKey(0)
    kx, kp = jax.random.split(key)
    x = jax.random.normal(kx, (T, B, C, H, W), dtype=jnp.float32)
    w_in, w_rec, w_out = init_params(kp, input_features, hidden_features,
                                     output_features)

    voltages = recnet_forward(x, w_in, w_rec, w_out, t_blk=4)
    jax.block_until_ready(voltages)
    assert voltages.shape == (T, B, output_features)
    assert jnp.all(jnp.isfinite(voltages))

    ref = recnet_reference(x, w_in, w_rec, w_out)
    assert jnp.allclose(voltages, ref, rtol=1e-4, atol=1e-6), "mismatch vs reference"

    print("KERNEL_OK")
</pallas_src>

<mosaic_0001>
module attributes {stable_mosaic.version = 11 : i64} {
  func.func @_recnet_kernel(%arg0: i32, %arg1: memref<4x8x128xf32, #tpu.memory_space<vmem>>, %arg2: memref<128x128xf32, #tpu.memory_space<vmem>>, %arg3: memref<128x128xf32, #tpu.memory_space<vmem>>, %arg4: memref<128x128xf32, #tpu.memory_space<vmem>>, %arg5: memref<4x8x128xf32, #tpu.memory_space<vmem>>, %arg6: memref<8x128xf32, #tpu.memory_space<vmem>>, %arg7: memref<8x128xf32, #tpu.memory_space<vmem>>, %arg8: memref<8x128xf32, #tpu.memory_space<vmem>>, %arg9: memref<8x128xf32, #tpu.memory_space<vmem>>, %arg10: memref<4x8x128xf32, #tpu.memory_space<vmem>>, %arg11: memref<4x8x128xf32, #tpu.memory_space<vmem>>, %arg12: memref<4x8x128xf32, #tpu.memory_space<vmem>>) attributes {dimension_semantics = [#tpu.dimension_semantics<arbitrary>], iteration_bounds = array<i64: 2>, scalar_prefetch = 0 : i64, scratch_operands = 7 : i64, tpu.core_type = #tpu.core_type<tc>, window_params = [{transform_indices = @transform_0, window_bounds = array<i64: 4, 8, 128>}, {pipeline_mode = #tpu.pipeline_mode<synchronous>, transform_indices = @transform_1, window_bounds = array<i64: 128, 128>}, {pipeline_mode = #tpu.pipeline_mode<synchronous>, transform_indices = @transform_2, window_bounds = array<i64: 128, 128>}, {pipeline_mode = #tpu.pipeline_mode<synchronous>, transform_indices = @transform_3, window_bounds = array<i64: 128, 128>}, {transform_indices = @transform_4, window_bounds = array<i64: 4, 8, 128>}]} {
    %c0_i32 = arith.constant 0 : i32
    %0 = arith.cmpi eq, %arg0, %c0_i32 : i32
    %1 = arith.extui %0 : i1 to i32
    %c0_i32_0 = arith.constant 0 : i32
    %2 = arith.cmpi ne, %1, %c0_i32_0 : i32
    scf.if %2 {
      %cst_107 = arith.constant 0.000000e+00 : f32
      %167 = vector.broadcast %cst_107 : f32 to vector<8x128xf32>
      %c0_108 = arith.constant 0 : index
      %c0_109 = arith.constant 0 : index
      %168 = vector.load %arg6[%c0_108, %c0_109] : memref<8x128xf32, #tpu.memory_space<vmem>>, vector<8x128xf32>
      tpu.vector_store %arg6[%c0_108, %c0_109], %167 {strides = array<i32>} : memref<8x128xf32, #tpu.memory_space<vmem>>, vector<8x128xf32>,
      %cst_110 = arith.constant 0.000000e+00 : f32
      %169 = vector.broadcast %cst_110 : f32 to vector<8x128xf32>
      %c0_111 = arith.constant 0 : index
      %c0_112 = arith.constant 0 : index
      %170 = vector.load %arg7[%c0_111, %c0_112] : memref<8x128xf32, #tpu.memory_space<vmem>>, vector<8x128xf32>
      tpu.vector_store %arg7[%c0_111, %c0_112], %169 {strides = array<i32>} : memref<8x128xf32, #tpu.memory_space<vmem>>, vector<8x128xf32>,
      %cst_113 = arith.constant 0.000000e+00 : f32
      %171 = vector.broadcast %cst_113 : f32 to vector<8x128xf32>
      %c0_114 = arith.constant 0 : index
      %c0_115 = arith.constant 0 : index
      %172 = vector.load %arg8[%c0_114, %c0_115] : memref<8x128xf32, #tpu.memory_space<vmem>>, vector<8x128xf32>
      tpu.vector_store %arg8[%c0_114, %c0_115], %171 {strides = array<i32>} : memref<8x128xf32, #tpu.memory_space<vmem>>, vector<8x128xf32>,
      %cst_116 = arith.constant 0.000000e+00 : f32
      %173 = vector.broadcast %cst_116 : f32 to vector<8x128xf32>
      %c0_117 = arith.constant 0 : index
      %c0_118 = arith.constant 0 : index
      %174 = vector.load %arg9[%c0_117, %c0_118] : memref<8x128xf32, #tpu.memory_space<vmem>>, vector<8x128xf32>
      tpu.vector_store %arg9[%c0_117, %c0_118], %173 {strides = array<i32>} : memref<8x128xf32, #tpu.memory_space<vmem>>, vector<8x128xf32>,
    } else {
    }
    %c0 = arith.constant 0 : index
    %c0_1 = arith.constant 0 : index
    %c0_2 = arith.constant 0 : index
    %3 = vector.load %arg1[%c0, %c0_1, %c0_2] : memref<4x8x128xf32, #tpu.memory_space<vmem>>, vector<4x8x128xf32>
    %4 = vector.shape_cast %3 : vector<4x8x128xf32> to vector<32x128xf32>
    %c0_3 = arith.constant 0 : index
    %c0_4 = arith.constant 0 : index
    %5 = vector.load %arg2[%c0_3, %c0_4] : memref<128x128xf32, #tpu.memory_space<vmem>>, vector<128x128xf32>
    %cst = arith.constant dense<0.000000e+00> : vector<32x128xf32>
    %6 = tpu.matmul %4, %5, %cst {dimension_numbers = #tpu.dot_dimension_numbers<[1], [0], [0], [1], [0, 0, 1, 1], [], []>} : vector<32x128xf32>, vector<128x128xf32>, vector<32x128xf32> -> vector<32x128xf32>
    %7 = vector.shape_cast %6 : vector<32x128xf32> to vector<4x8x128xf32>
    %c0_5 = arith.constant 0 : index
    %c0_6 = arith.constant 0 : index
    %c0_7 = arith.constant 0 : index
    %8 = vector.load %arg10[%c0_5, %c0_6, %c0_7] : memref<4x8x128xf32, #tpu.memory_space<vmem>>, vector<4x8x128xf32>
    tpu.vector_store %arg10[%c0_5, %c0_6, %c0_7], %7 {strides = array<i32>} : memref<4x8x128xf32, #tpu.memory_space<vmem>>, vector<4x8x128xf32>,
    %c0_8 = arith.constant 0 : index
    %c0_9 = arith.constant 0 : index
    %9 = vector.load %arg6[%c0_8, %c0_9] : memref<8x128xf32, #tpu.memory_space<vmem>>, vector<8x128xf32>
    %c0_10 = arith.constant 0 : index
    %c0_11 = arith.constant 0 : index
    %10 = vector.load %arg7[%c0_10, %c0_11] : memref<8x128xf32, #tpu.memory_space<vmem>>, vector<8x128xf32>
    %c0_i32_12 = arith.constant 0 : i32
    %11 = arith.index_cast %c0_i32_12 : i32 to index
    %c0_13 = arith.constant 0 : index
    %c0_14 = arith.constant 0 : index
    %12 = vector.load %arg10[%11, %c0_13, %c0_14] : memref<4x8x128xf32, #tpu.memory_space<vmem>>, vector<1x8x128xf32>
    %13 = vector.shape_cast %12 : vector<1x8x128xf32> to vector<8x128xf32>
    %c0_15 = arith.constant 0 : index
    %c0_16 = arith.constant 0 : index
    %14 = vector.load %arg3[%c0_15, %c0_16] : memref<128x128xf32, #tpu.memory_space<vmem>>, vector<128x128xf32>
    %cst_17 = arith.constant dense<0.000000e+00> : vector<8x128xf32>
    %15 = tpu.matmul %9, %14, %cst_17 {dimension_numbers = #tpu.dot_dimension_numbers<[1], [0], [0], [1], [0, 0, 1, 1], [], []>} : vector<8x128xf32>, vector<128x128xf32>, vector<8x128xf32> -> vector<8x128xf32>
    %16 = arith.addf %13, %15 : vector<8x128xf32>
    %cst_18 = arith.constant 9.99999993E-9 : f32
    %17 = vector.broadcast %cst_18 : f32 to vector<8x128xf32>
    %18 = arith.mulf %17, %16 : vector<8x128xf32>
    %19 = arith.addf %10, %18 : vector<8x128xf32>
    %cst_19 = arith.constant 2.500000e-08 : f32
    %20 = vector.broadcast %cst_19 : f32 to vector<8x128xf32>
    %21 = arith.cmpf oge, %19, %20 : vector<8x128xf32>
    %22 = arith.extui %21 : vector<8x128xi1> to vector<8x128xi32>
    %23 = arith.sitofp %22 : vector<8x128xi32> to vector<8x128xf32>
    %cst_20 = arith.constant 2.500000e-08 : f32
    %24 = vector.broadcast %cst_20 : f32 to vector<8x128xf32>
    %25 = arith.mulf %23, %24 : vector<8x128xf32>
    %26 = arith.subf %19, %25 : vector<8x128xf32>
    %27 = arith.index_cast %c0_i32_12 : i32 to index
    %c0_21 = arith.constant 0 : index
    %c0_22 = arith.constant 0 : index
    %28 = vector.load %arg11[%27, %c0_21, %c0_22] : memref<4x8x128xf32, #tpu.memory_space<vmem>>, vector<1x8x128xf32>
    %29 = vector.shape_cast %28 : vector<1x8x128xf32> to vector<8x128xf32>
    %30 = vector.shape_cast %23 : vector<8x128xf32> to vector<1x8x128xf32>
    tpu.vector_store %arg11[%27, %c0_21, %c0_22], %30 {strides = array<i32>} : memref<4x8x128xf32, #tpu.memory_space<vmem>>, vector<1x8x128xf32>,
    %c1_i32 = arith.constant 1 : i32
    %31 = arith.index_cast %c1_i32 : i32 to index
    %c0_23 = arith.constant 0 : index
    %c0_24 = arith.constant 0 : index
    %32 = vector.load %arg10[%31, %c0_23, %c0_24] : memref<4x8x128xf32, #tpu.memory_space<vmem>>, vector<1x8x128xf32>
    %33 = vector.shape_cast %32 : vector<1x8x128xf32> to vector<8x128xf32>
    %c0_25 = arith.constant 0 : index
    %c0_26 = arith.constant 0 : index
    %34 = vector.load %arg3[%c0_25, %c0_26] : memref<128x128xf32, #tpu.memory_space<vmem>>, vector<128x128xf32>
    %cst_27 = arith.constant dense<0.000000e+00> : vector<8x128xf32>
    %35 = tpu.matmul %23, %34, %cst_27 {dimension_numbers = #tpu.dot_dimension_numbers<[1], [0], [0], [1], [0, 0, 1, 1], [], []>} : vector<8x128xf32>, vector<128x128xf32>, vector<8x128xf32> -> vector<8x128xf32>
    %36 = arith.addf %33, %35 : vector<8x128xf32>
    %cst_28 = arith.constant 9.99999993E-9 : f32
    %37 = vector.broadcast %cst_28 : f32 to vector<8x128xf32>
    %38 = arith.mulf %37, %36 : vector<8x128xf32>
    %39 = arith.addf %26, %38 : vector<8x128xf32>
    %cst_29 = arith.constant 2.500000e-08 : f32
    %40 = vector.broadcast %cst_29 : f32 to vector<8x128xf32>
    %41 = arith.cmpf oge, %39, %40 : vector<8x128xf32>
    %42 = arith.extui %41 : vector<8x128xi1> to vector<8x128xi32>
    %43 = arith.sitofp %42 : vector<8x128xi32> to vector<8x128xf32>
    %cst_30 = arith.constant 2.500000e-08 : f32
    %44 = vector.broadcast %cst_30 : f32 to vector<8x128xf32>
    %45 = arith.mulf %43, %44 : vector<8x128xf32>
    %46 = arith.subf %39, %45 : vector<8x128xf32>
    %47 = arith.index_cast %c1_i32 : i32 to index
    %c0_31 = arith.constant 0 : index
    %c0_32 = arith.constant 0 : index
    %48 = vector.load %arg11[%47, %c0_31, %c0_32] : memref<4x8x128xf32, #tpu.memory_space<vmem>>, vector<1x8x128xf32>
    %49 = vector.shape_cast %48 : vector<1x8x128xf32> to vector<8x128xf32>
    %50 = vector.shape_cast %43 : vector<8x128xf32> to vector<1x8x128xf32>
    tpu.vector_store %arg11[%47, %c0_31, %c0_32], %50 {strides = array<i32>} : memref<4x8x128xf32, #tpu.memory_space<vmem>>, vector<1x8x128xf32>,
    %c2_i32 = arith.constant 2 : i32
    %51 = arith.index_cast %c2_i32 : i32 to index
    %c0_33 = arith.constant 0 : index
    %c0_34 = arith.constant 0 : index
    %52 = vector.load %arg10[%51, %c0_33, %c0_34] : memref<4x8x128xf32, #tpu.memory_space<vmem>>, vector<1x8x128xf32>
    %53 = vector.shape_cast %52 : vector<1x8x128xf32> to vector<8x128xf32>
    %c0_35 = arith.constant 0 : index
    %c0_36 = arith.constant 0 : index
    %54 = vector.load %arg3[%c0_35, %c0_36] : memref<128x128xf32, #tpu.memory_space<vmem>>, vector<128x128xf32>
    %cst_37 = arith.constant dense<0.000000e+00> : vector<8x128xf32>
    %55 = tpu.matmul %43, %54, %cst_37 {dimension_numbers = #tpu.dot_dimension_numbers<[1], [0], [0], [1], [0, 0, 1, 1], [], []>} : vector<8x128xf32>, vector<128x128xf32>, vector<8x128xf32> -> vector<8x128xf32>
    %56 = arith.addf %53, %55 : vector<8x128xf32>
    %cst_38 = arith.constant 9.99999993E-9 : f32
    %57 = vector.broadcast %cst_38 : f32 to vector<8x128xf32>
    %58 = arith.mulf %57, %56 : vector<8x128xf32>
    %59 = arith.addf %46, %58 : vector<8x128xf32>
    %cst_39 = arith.constant 2.500000e-08 : f32
    %60 = vector.broadcast %cst_39 : f32 to vector<8x128xf32>
    %61 = arith.cmpf oge, %59, %60 : vector<8x128xf32>
    %62 = arith.extui %61 : vector<8x128xi1> to vector<8x128xi32>
    %63 = arith.sitofp %62 : vector<8x128xi32> to vector<8x128xf32>
    %cst_40 = arith.constant 2.500000e-08 : f32
    %64 = vector.broadcast %cst_40 : f32 to vector<8x128xf32>
    %65 = arith.mulf %63, %64 : vector<8x128xf32>
    %66 = arith.subf %59, %65 : vector<8x128xf32>
    %67 = arith.index_cast %c2_i32 : i32 to index
    %c0_41 = arith.constant 0 : index
    %c0_42 = arith.constant 0 : index
    %68 = vector.load %arg11[%67, %c0_41, %c0_42] : memref<4x8x128xf32, #tpu.memory_space<vmem>>, vector<1x8x128xf32>
    %69 = vector.shape_cast %68 : vector<1x8x128xf32> to vector<8x128xf32>
    %70 = vector.shape_cast %63 : vector<8x128xf32> to vector<1x8x128xf32>
    tpu.vector_store %arg11[%67, %c0_41, %c0_42], %70 {strides = array<i32>} : memref<4x8x128xf32, #tpu.memory_space<vmem>>, vector<1x8x128xf32>,
    %c3_i32 = arith.constant 3 : i32
    %71 = arith.index_cast %c3_i32 : i32 to index
    %c0_43 = arith.constant 0 : index
    %c0_44 = arith.constant 0 : index
    %72 = vector.load %arg10[%71, %c0_43, %c0_44] : memref<4x8x128xf32, #tpu.memory_space<vmem>>, vector<1x8x128xf32>
    %73 = vector.shape_cast %72 : vector<1x8x128xf32> to vector<8x128xf32>
    %c0_45 = arith.constant 0 : index
    %c0_46 = arith.constant 0 : index
    %74 = vector.load %arg3[%c0_45, %c0_46] : memref<128x128xf32, #tpu.memory_space<vmem>>, vector<128x128xf32>
    %cst_47 = arith.constant dense<0.000000e+00> : vector<8x128xf32>
    %75 = tpu.matmul %63, %74, %cst_47 {dimension_numbers = #tpu.dot_dimension_numbers<[1], [0], [0], [1], [0, 0, 1, 1], [], []>} : vector<8x128xf32>, vector<128x128xf32>, vector<8x128xf32> -> vector<8x128xf32>
    %76 = arith.addf %73, %75 : vector<8x128xf32>
    %cst_48 = arith.constant 9.99999993E-9 : f32
    %77 = vector.broadcast %cst_48 : f32 to vector<8x128xf32>
    %78 = arith.mulf %77, %76 : vector<8x128xf32>
    %79 = arith.addf %66, %78 : vector<8x128xf32>
    %cst_49 = arith.constant 2.500000e-08 : f32
    %80 = vector.broadcast %cst_49 : f32 to vector<8x128xf32>
    %81 = arith.cmpf oge, %79, %80 : vector<8x128xf32>
    %82 = arith.extui %81 : vector<8x128xi1> to vector<8x128xi32>
    %83 = arith.sitofp %82 : vector<8x128xi32> to vector<8x128xf32>
    %cst_50 = arith.constant 2.500000e-08 : f32
    %84 = vector.broadcast %cst_50 : f32 to vector<8x128xf32>
    %85 = arith.mulf %83, %84 : vector<8x128xf32>
    %86 = arith.subf %79, %85 : vector<8x128xf32>
    %87 = arith.index_cast %c3_i32 : i32 to index
    %c0_51 = arith.constant 0 : index
    %c0_52 = arith.constant 0 : index
    %88 = vector.load %arg11[%87, %c0_51, %c0_52] : memref<4x8x128xf32, #tpu.memory_space<vmem>>, vector<1x8x128xf32>
    %89 = vector.shape_cast %88 : vector<1x8x128xf32> to vector<8x128xf32>
    %90 = vector.shape_cast %83 : vector<8x128xf32> to vector<1x8x128xf32>
    tpu.vector_store %arg11[%87, %c0_51, %c0_52], %90 {strides = array<i32>} : memref<4x8x128xf32, #tpu.memory_space<vmem>>, vector<1x8x128xf32>,
    %c4_i32 = arith.constant 4 : i32
    %c0_53 = arith.constant 0 : index
    %c0_54 = arith.constant 0 : index
    %91 = vector.load %arg6[%c0_53, %c0_54] : memref<8x128xf32, #tpu.memory_space<vmem>>, vector<8x128xf32>
    tpu.vector_store %arg6[%c0_53, %c0_54], %83 {strides = array<i32>} : memref<8x128xf32, #tpu.memory_space<vmem>>, vector<8x128xf32>,
    %c0_55 = arith.constant 0 : index
    %c0_56 = arith.constant 0 : index
    %92 = vector.load %arg7[%c0_55, %c0_56] : memref<8x128xf32, #tpu.memory_space<vmem>>, vector<8x128xf32>
    tpu.vector_store %arg7[%c0_55, %c0_56], %86 {strides = array<i32>} : memref<8x128xf32, #tpu.memory_space<vmem>>, vector<8x128xf32>,
    %c0_57 = arith.constant 0 : index
    %c0_58 = arith.constant 0 : index
    %c0_59 = arith.constant 0 : index
    %93 = vector.load %arg11[%c0_57, %c0_58, %c0_59] : memref<4x8x128xf32, #tpu.memory_space<vmem>>, vector<4x8x128xf32>
    %94 = vector.shape_cast %93 : vector<4x8x128xf32> to vector<32x128xf32>
    %c0_60 = arith.constant 0 : index
    %c0_61 = arith.constant 0 : index
    %95 = vector.load %arg4[%c0_60, %c0_61] : memref<128x128xf32, #tpu.memory_space<vmem>>, vector<128x128xf32>
    %cst_62 = arith.constant dense<0.000000e+00> : vector<32x128xf32>
    %96 = tpu.matmul %94, %95, %cst_62 {dimension_numbers = #tpu.dot_dimension_numbers<[1], [0], [0], [1], [0, 0, 1, 1], [], []>} : vector<32x128xf32>, vector<128x128xf32>, vector<32x128xf32> -> vector<32x128xf32>
    %97 = vector.shape_cast %96 : vector<32x128xf32> to vector<4x8x128xf32>
    %c0_63 = arith.constant 0 : index
    %c0_64 = arith.constant 0 : index
    %c0_65 = arith.constant 0 : index
    %98 = vector.load %arg12[%c0_63, %c0_64, %c0_65] : memref<4x8x128xf32, #tpu.memory_space<vmem>>, vector<4x8x128xf32>
    tpu.vector_store %arg12[%c0_63, %c0_64, %c0_65], %97 {strides = array<i32>} : memref<4x8x128xf32, #tpu.memory_space<vmem>>, vector<4x8x128xf32>,
    %c0_66 = arith.constant 0 : index
    %c0_67 = arith.constant 0 : index
    %99 = vector.load %arg8[%c0_66, %c0_67] : memref<8x128xf32, #tpu.memory_space<vmem>>, vector<8x128xf32>
    %c0_68 = arith.constant 0 : index
    %c0_69 = arith.constant 0 : index
    %100 = vector.load %arg9[%c0_68, %c0_69] : memref<8x128xf32, #tpu.memory_space<vmem>>, vector<8x128xf32>
    %c0_i32_70 = arith.constant 0 : i32
    %cst_71 = arith.constant 0.000000e+00 : f32
    %101 = vector.broadcast %cst_71 : f32 to vector<8x128xf32>
    %102 = arith.subf %101, %99 : vector<8x128xf32>
    %103 = arith.addf %102, %100 : vector<8x128xf32>
    %cst_72 = arith.constant 9.99999993E-9 : f32
    %104 = vector.broadcast %cst_72 : f32 to vector<8x128xf32>
    %105 = arith.mulf %104, %103 : vector<8x128xf32>
    %106 = arith.addf %99, %105 : vector<8x128xf32>
    %cst_73 = arith.constant 1.000000e+00 : f32
    %107 = vector.broadcast %cst_73 : f32 to vector<8x128xf32>
    %108 = arith.mulf %100, %107 : vector<8x128xf32>
    %109 = arith.index_cast %c0_i32_70 : i32 to index
    %c0_74 = arith.constant 0 : index
    %c0_75 = arith.constant 0 : index
    %110 = vector.load %arg12[%109, %c0_74, %c0_75] : memref<4x8x128xf32, #tpu.memory_space<vmem>>, vector<1x8x128xf32>
    %111 = vector.shape_cast %110 : vector<1x8x128xf32> to vector<8x128xf32>
    %112 = arith.addf %108, %111 : vector<8x128xf32>
    %113 = arith.index_cast %c0_i32_70 : i32 to index
    %c0_76 = arith.constant 0 : index
    %c0_77 = arith.constant 0 : index
    %114 = vector.load %arg5[%113, %c0_76, %c0_77] : memref<4x8x128xf32, #tpu.memory_space<vmem>>, vector<1x8x128xf32>
    %115 = vector.shape_cast %114 : vector<1x8x128xf32> to vector<8x128xf32>
    %116 = vector.shape_cast %106 : vector<8x128xf32> to vector<1x8x128xf32>
    tpu.vector_store %arg5[%113, %c0_76, %c0_77], %116 {strides = array<i32>} : memref<4x8x128xf32, #tpu.memory_space<vmem>>, vector<1x8x128xf32>,
    %c1_i32_78 = arith.constant 1 : i32
    %cst_79 = arith.constant 0.000000e+00 : f32
    %117 = vector.broadcast %cst_79 : f32 to vector<8x128xf32>
    %118 = arith.subf %117, %106 : vector<8x128xf32>
    %119 = arith.addf %118, %112 : vector<8x128xf32>
    %cst_80 = arith.constant 9.99999993E-9 : f32
    %120 = vector.broadcast %cst_80 : f32 to vector<8x128xf32>
    %121 = arith.mulf %120, %119 : vector<8x128xf32>
    %122 = arith.addf %106, %121 : vector<8x128xf32>
    %cst_81 = arith.constant 1.000000e+00 : f32
    %123 = vector.broadcast %cst_81 : f32 to vector<8x128xf32>
    %124 = arith.mulf %112, %123 : vector<8x128xf32>
    %125 = arith.index_cast %c1_i32_78 : i32 to index
    %c0_82 = arith.constant 0 : index
    %c0_83 = arith.constant 0 : index
    %126 = vector.load %arg12[%125, %c0_82, %c0_83] : memref<4x8x128xf32, #tpu.memory_space<vmem>>, vector<1x8x128xf32>
    %127 = vector.shape_cast %126 : vector<1x8x128xf32> to vector<8x128xf32>
    %128 = arith.addf %124, %127 : vector<8x128xf32>
    %129 = arith.index_cast %c1_i32_78 : i32 to index
    %c0_84 = arith.constant 0 : index
    %c0_85 = arith.constant 0 : index
    %130 = vector.load %arg5[%129, %c0_84, %c0_85] : memref<4x8x128xf32, #tpu.memory_space<vmem>>, vector<1x8x128xf32>
    %131 = vector.shape_cast %130 : vector<1x8x128xf32> to vector<8x128xf32>
    %132 = vector.shape_cast %122 : vector<8x128xf32> to vector<1x8x128xf32>
    tpu.vector_store %arg5[%129, %c0_84, %c0_85], %132 {strides = array<i32>} : memref<4x8x128xf32, #tpu.memory_space<vmem>>, vector<1x8x128xf32>,
    %c2_i32_86 = arith.constant 2 : i32
    %cst_87 = arith.constant 0.000000e+00 : f32
    %133 = vector.broadcast %cst_87 : f32 to vector<8x128xf32>
    %134 = arith.subf %133, %122 : vector<8x128xf32>
    %135 = arith.addf %134, %128 : vector<8x128xf32>
    %cst_88 = arith.constant 9.99999993E-9 : f32
    %136 = vector.broadcast %cst_88 : f32 to vector<8x128xf32>
    %137 = arith.mulf %136, %135 : vector<8x128xf32>
    %138 = arith.addf %122, %137 : vector<8x128xf32>
    %cst_89 = arith.constant 1.000000e+00 : f32
    %139 = vector.broadcast %cst_89 : f32 to vector<8x128xf32>
    %140 = arith.mulf %128, %139 : vector<8x128xf32>
    %141 = arith.index_cast %c2_i32_86 : i32 to index
    %c0_90 = arith.constant 0 : index
    %c0_91 = arith.constant 0 : index
    %142 = vector.load %arg12[%141, %c0_90, %c0_91] : memref<4x8x128xf32, #tpu.memory_space<vmem>>, vector<1x8x128xf32>
    %143 = vector.shape_cast %142 : vector<1x8x128xf32> to vector<8x128xf32>
    %144 = arith.addf %140, %143 : vector<8x128xf32>
    %145 = arith.index_cast %c2_i32_86 : i32 to index
    %c0_92 = arith.constant 0 : index
    %c0_93 = arith.constant 0 : index
    %146 = vector.load %arg5[%145, %c0_92, %c0_93] : memref<4x8x128xf32, #tpu.memory_space<vmem>>, vector<1x8x128xf32>
    %147 = vector.shape_cast %146 : vector<1x8x128xf32> to vector<8x128xf32>
    %148 = vector.shape_cast %138 : vector<8x128xf32> to vector<1x8x128xf32>
    tpu.vector_store %arg5[%145, %c0_92, %c0_93], %148 {strides = array<i32>} : memref<4x8x128xf32, #tpu.memory_space<vmem>>, vector<1x8x128xf32>,
    %c3_i32_94 = arith.constant 3 : i32
    %cst_95 = arith.constant 0.000000e+00 : f32
    %149 = vector.broadcast %cst_95 : f32 to vector<8x128xf32>
    %150 = arith.subf %149, %138 : vector<8x128xf32>
    %151 = arith.addf %150, %144 : vector<8x128xf32>
    %cst_96 = arith.constant 9.99999993E-9 : f32
    %152 = vector.broadcast %cst_96 : f32 to vector<8x128xf32>
    %153 = arith.mulf %152, %151 : vector<8x128xf32>
    %154 = arith.addf %138, %153 : vector<8x128xf32>
    %cst_97 = arith.constant 1.000000e+00 : f32
    %155 = vector.broadcast %cst_97 : f32 to vector<8x128xf32>
    %156 = arith.mulf %144, %155 : vector<8x128xf32>
    %157 = arith.index_cast %c3_i32_94 : i32 to index
    %c0_98 = arith.constant 0 : index
    %c0_99 = arith.constant 0 : index
    %158 = vector.load %arg12[%157, %c0_98, %c0_99] : memref<4x8x128xf32, #tpu.memory_space<vmem>>, vector<1x8x128xf32>
    %159 = vector.shape_cast %158 : vector<1x8x128xf32> to vector<8x128xf32>
    %160 = arith.addf %156, %159 : vector<8x128xf32>
    %161 = arith.index_cast %c3_i32_94 : i32 to index
    %c0_100 = arith.constant 0 : index
    %c0_101 = arith.constant 0 : index
    %162 = vector.load %arg5[%161, %c0_100, %c0_101] : memref<4x8x128xf32, #tpu.memory_space<vmem>>, vector<1x8x128xf32>
    %163 = vector.shape_cast %162 : vector<1x8x128xf32> to vector<8x128xf32>
    %164 = vector.shape_cast %154 : vector<8x128xf32> to vector<1x8x128xf32>
    tpu.vector_store %arg5[%161, %c0_100, %c0_101], %164 {strides = array<i32>} : memref<4x8x128xf32, #tpu.memory_space<vmem>>, vector<1x8x128xf32>,
    %c4_i32_102 = arith.constant 4 : i32
    %c0_103 = arith.constant 0 : index
    %c0_104 = arith.constant 0 : index
    %165 = vector.load %arg8[%c0_103, %c0_104] : memref<8x128xf32, #tpu.memory_space<vmem>>, vector<8x128xf32>
    tpu.vector_store %arg8[%c0_103, %c0_104], %154 {strides = array<i32>} : memref<8x128xf32, #tpu.memory_space<vmem>>, vector<8x128xf32>,
    %c0_105 = arith.constant 0 : index
    %c0_106 = arith.constant 0 : index
    %166 = vector.load %arg9[%c0_105, %c0_106] : memref<8x128xf32, #tpu.memory_space<vmem>>, vector<8x128xf32>
    tpu.vector_store %arg9[%c0_105, %c0_106], %160 {strides = array<i32>} : memref<8x128xf32, #tpu.memory_space<vmem>>, vector<8x128xf32>,
    return
  }
  func.func @transform_0(%arg0: i32) -> (i32, i32, i32) {
    %c0_i32 = arith.constant 0 : i32
    %c0_i32_0 = arith.constant 0 : i32
    %c0_i32_1 = arith.constant 0 : i32
    return %arg0, %c0_i32, %c0_i32_0 : i32, i32, i32
  }
  func.func @transform_1(%arg0: i32) -> (i32, i32) {
    %c0_i32 = arith.constant 0 : i32
    %c0_i32_0 = arith.constant 0 : i32
    %c0_i32_1 = arith.constant 0 : i32
    return %c0_i32, %c0_i32_0 : i32, i32
  }
  func.func @transform_2(%arg0: i32) -> (i32, i32) {
    %c0_i32 = arith.constant 0 : i32
    %c0_i32_0 = arith.constant 0 : i32
    %c0_i32_1 = arith.constant 0 : i32
    return %c0_i32, %c0_i32_0 : i32, i32
  }
  func.func @transform_3(%arg0: i32) -> (i32, i32) {
    %c0_i32 = arith.constant 0 : i32
    %c0_i32_0 = arith.constant 0 : i32
    %c0_i32_1 = arith.constant 0 : i32
    return %c0_i32, %c0_i32_0 : i32, i32
  }
  func.func @transform_4(%arg0: i32) -> (i32, i32, i32) {
    %c0_i32 = arith.constant 0 : i32
    %c0_i32_0 = arith.constant 0 : i32
    %c0_i32_1 = arith.constant 0 : i32
    return %arg0, %c0_i32, %c0_i32_0 : i32, i32, i32
  }
}

</mosaic_0001>

<bundles_post_ra>
// kernel: tpu_custom_call.1
= control target key start
LH: loop header
LB: loop body
LE: loop exit
PB: predicated region body
PF: predicated region fallthrough
CT: control target
= control target key end

     0   :  { %9 = vsyncpa [#allocation10], 0  ;;  %s2270_s0 = inlined_call_operand.hbm [shape: f32[8,8,128], index: 0, kind: input, shape index: {}]   ;;  %s2271_s1 = inlined_call_operand.hbm [shape: f32[128,128], index: 1, kind: input, shape index: {}]   ;;  %s2272_s2 = inlined_call_operand.hbm [shape: f32[128,128], index: 2, kind: input, shape index: {}]   ;;  %s2273_s3 = inlined_call_operand.hbm [shape: f32[128,128], index: 3, kind: input, shape index: {}]   ;;  %s2274_s4 = inlined_call_operand.hbm [shape: f32[8,8,128], index: 4, kind: output, shape index: {}]  }
   0x1   :  { %11 = vsyncpa [#allocation10 + $0x1], 0 }
   0x2   :  { %12 = vsyncpa [#allocation13], 0 }
   0x3   :  { %13 = vsyncpa [#allocation16], 0 }
   0x4   :  { %14 = vsyncpa [#allocation11], 0 }
   0x5   :  { %16 = vsyncpa [#allocation11 + $0x1], 0  ;;  %s1872_s15 = smov 0   ;;  %s1874_s16 = smov 0  }
   0x6   :  { %s1876_s17 = smov 0   ;;  %s1878_s18 = smov 0  }
   0x7 LB: > { %s1893_s19 = sadd.s32 4294967295, %s1831_s18   ;;  %s1036_s20 = sadd.s32 4294967294, %s1831_s18   ;;  %s1831_s18 = sphi %s1878_s18, %s2298_s18   ;;  %s1827_s17 = sphi %s1876_s17, %s2297_s17   ;;  %s1823_s16 = sphi %s1874_s16, %s2296_s16   ;;  %s1819_s15 = sphi %s1872_s15, %s2295_s15  }
   0x8   : > { %p42_p0 = scmp.ne.s32.totalorder %s1823_s16, %s1819_s15  ;;  %p2275_p1 = scmp.eq.s32.totalorder %s1893_s19, 0 }
   0x9   : > { %p135_p3 = scmp.eq.s32.totalorder %s1036_s20, 1  ;;  %p1037_p5 = scmp.ge.s32.totalorder %s1831_s18, 1 }
   0xa   : > { %p1902_p4 = por %p2275_p1, %p42_p0  ;;  %p142_p7 = scmp.lt.s32.totalorder %s1831_s18, 3 }
   0xb   : > { %p1907_p6 = por %p135_p3, %p42_p0  ;;  %s1833_s24 = smov [#allocation12]  }
   0xc   : > { %s2278_s21 = scalar_select %p1902_p4, 1, 0 }
   0xd   : > { %s2279_s22 = scalar_select %p1907_p6, 1, 0 }
   0xe   : > { %p1913_p9 = pnand %p1037_p5, %p142_p7  ;;  %s154_s25 = sshll.u32 %s1833_s24, 4  ;;  %s1917_s25 = int_to_ptr.vmem [resolvable:$true] %s154_s25 }
   0xf   : > { %s1834_s27 = smov [#allocation14]   ;;  %s1835_s29 = smov [#allocation15]  }
  0x10   : > { %s2280_s23 = scalar_select %p1913_p9, 1, 0 }
  0x11   : > { %p1573_p10 = pneg %p1913_p9  ;;  %s167_s28 = sshll.u32 %s1834_s27, 4  ;;  %s1928_s28 = int_to_ptr.vmem [resolvable:$true] %s167_s28 }
  0x12   : > { %s1930_s30 = sshll.u32 %s1835_s29, 4  ;;  %s1643_s7 = scalar_lea.hbm %s2271_s1, 2048  ;;  %s181_s30 = int_to_ptr.vmem [resolvable:$true] %s1930_s30 }
  0x13   : > { %p1924_p12 = pnand %p1573_p10, %p2275_p1  ;;  %p1644_p13 = scmp.ne.s32.totalorder %s2271_s1, %s1643_s7 }
  0x14   : > { %p1650_p7 = scmp.lt.u32.totalorder %s1643_s7, %s2271_s1 }
  0x15   : > { %p1940_p0 = pneg %p1924_p12 }
  0x17   : > { %p1646_p3 = pnand %p1940_p0, %p1644_p13 }
  0x19   : > { %p1647_p5 = pneg %p1646_p3 }
  0x1b   : > { %p1652_p10 = pnand %p1650_p7, %p1647_p5 }
  0x1d   : > { %1655 = shalt.err (!%p1652_p10)
}
  0x1e   : > { %s1656_s13 = scalar_lea.vmem %s1917_s25, 2048  ;;  %p1664_p2 = scmp.lt.s32.totalorder %s1917_s25, %s1917_s25 }
  0x1f   : > { %p1657_p11 = scmp.ne.s32.totalorder %s1917_s25, %s1656_s13  ;;  %p1665_p6 = scmp.lt.s32.totalorder %s1656_s13, %s1656_s13 }
  0x21   : > { %p1659_p8 = pnand %p1657_p11, %p1940_p0  ;;  %p1666_p13 = por %p1665_p6, %p1664_p2 }
  0x23   : > { %p1660_p1 = pneg %p1659_p8 }
  0x25   : > { %p1667_p3 = pnand %p1666_p13, %p1660_p1 }
  0x27   : > { %1670 = shalt.err (!%p1667_p3)
}
  0x28   : > { %s1836_s14 = smov 128   ;;  %s1837_s20 = smov 8  }
  0x29   : > { %1576 = dma.hbm_to_vmem [thread:$0]  (!%p1924_p12), %s2271_s1, 2048, %s1917_s25, [#allocation13], %s1836_s14, %s1836_s14, %s1837_s20  }
  0x2a   : > { %s1671_s6 = scalar_lea.hbm %s2272_s2, 2048 }
  0x2b   : > { %p1672_p1 = scmp.ne.s32.totalorder %s2272_s2, %s1671_s6  ;;  %p1678_p8 = scmp.lt.u32.totalorder %s1671_s6, %s2272_s2 }
  0x2d   : > { %p1674_p2 = pnand %p1672_p1, %p1940_p0 }
  0x2f   : > { %p1675_p6 = pneg %p1674_p2 }
  0x31   : > { %p1680_p11 = pnand %p1678_p8, %p1675_p6 }
  0x33   : > { %1683 = shalt.err (!%p1680_p11)
}
  0x34   : > { %s1684_s25 = scalar_lea.vmem %s1928_s28, 2048  ;;  %p1692_p13 = scmp.lt.s32.totalorder %s1928_s28, %s1928_s28 }
  0x35   : > { %p1685_p5 = scmp.ne.s32.totalorder %s1928_s28, %s1684_s25  ;;  %p1693_p3 = scmp.lt.s32.totalorder %s1684_s25, %s1684_s25 }
  0x37   : > { %p1687_p7 = pnand %p1685_p5, %p1940_p0  ;;  %p1694_p1 = por %p1693_p3, %p1692_p13 }
  0x39   : > { %p1688_p10 = pneg %p1687_p7 }
  0x3b   : > { %p1695_p2 = pnand %p1694_p1, %p1688_p10 }
  0x3d   : > { %1698 = shalt.err (!%p1695_p2)
}
  0x3e   : > { %1579 = dma.hbm_to_vmem [thread:$0]  (!%p1924_p12), %s2272_s2, 2048, %s1928_s28, [#allocation13], %s1836_s14, %s1836_s14, %s1837_s20  }
  0x3f   : > { %s1699_s29 = scalar_lea.hbm %s2273_s3, 2048 }
  0x40   : > { %p1700_p6 = scmp.ne.s32.totalorder %s2273_s3, %s1699_s29  ;;  %p1706_p5 = scmp.lt.u32.totalorder %s1699_s29, %s2273_s3 }
  0x42   : > { %p1702_p8 = pnand %p1700_p6, %p1940_p0 }
  0x44   : > { %p1703_p11 = pneg %p1702_p8 }
  0x46   : > { %p1708_p7 = pnand %p1706_p5, %p1703_p11 }
  0x48   : > { %1711 = shalt.err (!%p1708_p7)
}
  0x49   : > { %s1712_s9 = scalar_lea.vmem %s181_s30, 2048  ;;  %p1720_p1 = scmp.lt.s32.totalorder %s181_s30, %s181_s30 }
  0x4a   : > { %p1713_p10 = scmp.ne.s32.totalorder %s181_s30, %s1712_s9  ;;  %p1721_p2 = scmp.lt.s32.totalorder %s1712_s9, %s1712_s9 }
  0x4c   : > { %p1715_p13 = pnand %p1713_p10, %p1940_p0  ;;  %p1722_p4 = por %p1721_p2, %p1720_p1 }
  0x4e   : > { %p1716_p3 = pneg %p1715_p13 }
  0x50   : > { %p1723_p9 = pnand %p1722_p4, %p1716_p3 }
  0x52   : > { %1726 = shalt.err (!%p1723_p9)
}
  0x53   : > { %1582 = dma.hbm_to_vmem [thread:$0]  (!%p1924_p12), %s2273_s3, 2048, %s181_s30, [#allocation16], %s1836_s14, %s1836_s14, %s1837_s20  }
  0x54   : > { %s2013_s10 = sadd.s32 1, %s1831_s18   ;;  %s29_s25 = sadd.s32 1, %s1827_s17 }
  0x55   : > { %s26_s26 = ssub.s32 %s1831_s18, %s2013_s10  ;;  %p36_p9 = scmp.ne.s32.totalorder %s1827_s17, %s1823_s16 }
  0x56   : > { %p27_p4 = scmp.eq.s32.totalorder %s26_s26, 0  ;;  %p37_p0 = scmp.eq.s32.totalorder %s1831_s18, 0 }
  0x57   : > { %p1594_p6 = scmp.lt.s32.totalorder %s1831_s18, 2  ;;  %p2283_p11 = scmp.eq.s32.totalorder %s1893_s19, 1 }
  0x58   : > { %s2023_s12 = scalar_select %p27_p4, %s1827_s17, %s29_s25  }
  0x59   : > { %p38_p8 = por %p37_p0, %p36_p9  ;;  %p2027_p5 = por %p2283_p11, %p36_p9 }
  0x5a   : > { %s194_s24 = sand.u32 1, %s1827_s17   ;;  %s1067_s27 = sshll.u32 %s1831_s18, 9 }
  0x5b   : > { %s1042_s30 = sshll.u32 %s194_s24, 5  ;;  %s2036_s6 = scalar_lea.hbm %s2270_s0, %s1067_s27 }
  0x5c   : > { %s198_s7 = scalar_lea.vmem [#allocation9], %s1042_s30  ;;  %p2038_p12 = pnand %p1594_p6, %p38_p8 }
  0x5d   : > { %s205_s8 = sshll.u32 %s198_s7, 4  ;;  %s2044_s28 = scalar_lea.sflag [#allocation10], %s194_s24  ;;  %s2042_s8 = int_to_ptr.vmem [resolvable:$true] %s205_s8 }
  0x5e   : > { %s1727_s11 = scalar_lea.hbm %s2036_s6, 512  ;;  %p1729_p10 = pneg %p2038_p12 }
  0x5f   : > { %p1728_p7 = scmp.ne.s32.totalorder %s2036_s6, %s1727_s11  ;;  %s1732_s27 = scalar_lea.hbm %s2270_s0, 1024 }
  0x60   : > { %p1733_p1 = scmp.lt.u32.totalorder %s2036_s6, %s2270_s0  ;;  %p1734_p2 = scmp.lt.u32.totalorder %s1732_s27, %s1727_s11 }
  0x61   : > { %p1730_p13 = pnand %p1729_p10, %p1728_p7  ;;  %p1736_p9 = scmp.lt.u32.totalorder %s1727_s11, %s2036_s6 }
  0x62   : > { %p1735_p4 = por %p1734_p2, %p1733_p1 }
  0x63   : > { %p1731_p3 = pneg %p1730_p13 }
  0x64   : > { %p1737_p0 = por %p1736_p9, %p1735_p4 }
  0x66   : > { %p1738_p6 = pnand %p1737_p0, %p1731_p3 }
  0x68   : > { %1741 = shalt.err (!%p1738_p6)
}
  0x69   : > { %s1742_s24 = scalar_lea.vmem %s2042_s8, 512  ;;  %s1838_s5 = smov [#allocation9]  }
  0x6a   : > { %p1743_p8 = scmp.ne.s32.totalorder %s2042_s8, %s1742_s24  ;;  %s1747_s7 = sshll.u32 %s1838_s5, 4  ;;  %s1748_s7 = int_to_ptr.vmem [resolvable:$false] %s1747_s7 }
  0x6b   : > { %s1749_s26 = scalar_lea.vmem %s1748_s7, 1024  ;;  %p1750_p13 = scmp.lt.s32.totalorder %s2042_s8, %s1748_s7 }
  0x6c   : > { %p1745_p11 = pnand %p1743_p8, %p1729_p10  ;;  %p1751_p1 = scmp.lt.s32.totalorder %s1749_s26, %s1742_s24 }
  0x6e   : > { %p1746_p7 = pneg %p1745_p11  ;;  %p1752_p2 = por %p1751_p1, %p1750_p13 }
  0x70   : > { %p1753_p4 = pnand %p1752_p2, %p1746_p7 }
  0x72   : > { %1756 = shalt.err (!%p1753_p4)
}
  0x73   : > { %1586 = dma.hbm_to_vmem [thread:$0]  (!%p2038_p12), %s2036_s6, 512, %s2042_s8, %s2044_s28, %s1836_s14, %s1836_s14, %s1837_s20  }
  0x74   : > { %p2286_p10 = scmp.ne.s32.totalorder %s2280_s23, 0 }
  0x75   : > { %s2078_s11 = sand.u32 (!%p2286_p10), 1, %s1823_s16   ;;  %p2287_p3 = scmp.ne.s32.totalorder (!%p2286_p10), %s2278_s21, 0 }
  0x76   : > { %217 = sbr.rel (%p2286_p10) target bundleno = 1290 (0x50a), region = 36  ;;  %s1046_s25 = sshll.u32 (!%p2286_p10), %s2078_s11, 5 }
  0x77   : > { %s220_s27 = scalar_lea.sflag (!%p2286_p10), [#allocation10], %s2078_s11  ;;  %s2082_s30 = scalar_lea.vmem (!%p2286_p10), [#allocation9], %s1046_s25 }
  0x7d   : > { %1802 = dma.done.wait (%p2287_p3), %s220_s27, 512  }
  0x7e   : > { %1804 = vsyncadd (%p2287_p3), %s220_s27, 4294966784  ;;  %p2288_p12 = scmp.eq.s32.totalorder %s1893_s19, 0 }
  0x80   : > { %1806 = dma.done.wait (%p2288_p12), [#allocation13], 4096   ;;  %p2289_p9 = pmov %p2288_p12 }
  0x82   : > { %1808 = vsyncadd (%p2289_p9), [#allocation13], 4294963200  ;;  %p2290_p0 = pmov %p2289_p9 }
  0x84   : > { %1810 = dma.done.wait (%p2290_p0), [#allocation16], 2048   ;;  %p2291_p6 = pmov %p2290_p0 }
  0x85   : > { %s2096_s23 = scalar_lea.vmem [#allocation17], %s1046_s25  ;;  %p2292_p8 = scmp.ne.s32.totalorder %s1893_s19, 0 }
  0x86   : > { %1812 = vsyncadd (%p2291_p6), [#allocation16], 4294965248  ;;  %v1839_v0 = vmov (!%p2292_p8), 0.0  }
  0x87   : > { %265 = sbr.rel (%p2292_p8) target bundleno = 142 (0x8e), region = 56  ;;  %266 = vst [vmem:[#allocation2] sm:$0xff] (!%p2292_p8), %v1839_v0  ;;  %267 = vst [vmem:[#allocation3] sm:$0xff] (!%p2292_p8), %v1839_v0 }
  0x88   : > { %268 = vst [vmem:[#allocation4] sm:$0xff] (!%p2292_p8), %v1839_v0  ;;  %269 = vst [vmem:[#allocation5] sm:$0xff] (!%p2292_p8), %v1839_v0 }
  0x8e PF: > { %v274_v1 = vld [vmem:[#allocation12] sm:$0xff]  ;;  %v275_v2 = vld [vmem:[#allocation12 + $0x8] sm:$0xff]  ;;  %v1840_v5 = vmov 0.0|0.0   ;;  %v276_v7 = vld [vmem:[#allocation12 + $0x10] sm:$0xff]  ;;  %vm1841_vm0 = vmmov 0   ;;  %v1842_v9 = vmov 0.0  }
  0x8f   : > { %v382_v3 = vld [vmem:[#allocation14] sm:$0xff]  ;;  %v1397_v4 = vpack.c.bf16 %v275_v2, %v274_v1  ;;  %1429 = vmatprep.subr.bf16.mxu1 %v1840_v5  ;;  %v383_v6 = vld [vmem:[#allocation14 + $0x8] sm:$0xff]  ;;  %v277_v8 = vld [vmem:[#allocation12 + $0x18] sm:$0xff]  ;;  %1251 = vmatprep.mubr.msk.f32.mxu1 %vm1841_vm0, %v1842_v9  ;;  %v1843_v0 = vmov 1.0   ;;  %s1068_s21 = sshll.u32 %s1893_s19, 9  ;;  %s934_s14 = sshll.u32 %s2096_s23, 4  ;;  %s2225_s14 = int_to_ptr.vmem [resolvable:$true] %s934_s14 }
  0x90   : > { %v2103_v10 = vpack.c.bf16 %v383_v6, %v382_v3  ;;  %v1401_v11 = vpack.c.bf16 %v277_v8, %v276_v7  ;;  %v384_v12 = vld [vmem:[#allocation14 + $0x10] sm:$0xff]  ;;  %v385_v13 = vld [vmem:[#allocation14 + $0x18] sm:$0xff]  ;;  %v278_v14 = vld [vmem:[#allocation12 + $0x20] sm:$0xff]  ;;  %s2223_s8 = scalar_lea.hbm %s2274_s4, %s1068_s21  ;;  %s921_s9 = scalar_lea.sflag [#allocation11], %s2078_s11 }
  0x91   : > { %1398 = vmatprep.subr.bf16.mxu0 %v1397_v4  ;;  %v279_v15 = vld [vmem:[#allocation12 + $0x28] sm:$0xff]  ;;  %v2106_v16 = vpack.c.bf16 %v385_v13, %v384_v12  ;;  %v386_v18 = vld [vmem:[#allocation14 + $0x20] sm:$0xff]  ;;  %v280_v20 = vld [vmem:[#allocation12 + $0x30] sm:$0xff]  ;;  %s1757_s28 = scalar_lea.vmem %s2225_s14, 512  ;;  %s1844_s19 = smov [#allocation17]  }
  0x92   : > { %1400 = vmatpush3.bf16.msra.mxu0 %v1397_v4  ;;  %1431 = vmatpush3.bf16.msra.mxu1 %v2103_v10  ;;  %v1405_v17 = vpack.c.bf16 %v279_v15, %v278_v14  ;;  %v387_v19 = vld [vmem:[#allocation14 + $0x28] sm:$0xff]  ;;  %v281_v21 = vld [vmem:[#allocation12 + $0x38] sm:$0xff]  ;;  %v388_v24 = vld [vmem:[#allocation14 + $0x30] sm:$0xff]  ;;  %p1758_p11 = scmp.ne.s32.totalorder %s2225_s14, %s1757_s28  ;;  %s1761_s29 = sshll.u32 %s1844_s19, 4  ;;  %s1762_s29 = int_to_ptr.vmem [resolvable:$false] %s1761_s29 }
  0x93   : > { %1402 = vmatprep.subr.bf16.mxu0 %v1401_v11  ;;  %1432 = vmatprep.subr.bf16.mxu1 %v1840_v5  ;;  %v2110_v22 = vpack.c.bf16 %v387_v19, %v386_v18  ;;  %v1409_v23 = vpack.c.bf16 %v281_v21, %v280_v20  ;;  %v389_v25 = vld [vmem:[#allocation14 + $0x38] sm:$0xff]  ;;  %v282_v26 = vld [vmem:[#allocation12 + $0x40] sm:$0xff]  ;;  %v283_v27 = vld [vmem:[#allocation12 + $0x48] sm:$0xff]  ;;  %s1763_s24 = scalar_lea.vmem %s1762_s29, 1024  ;;  %p1764_p1 = scmp.lt.s32.totalorder %s2225_s14, %s1762_s29 }
  0x94   : > { %v270_v28 = vld [vmem:[%s2082_s30] sm:$0xff]  ;;  %v2115_v29 = vpack.c.bf16 %v389_v25, %v388_v24  ;;  %v1413_v30 = vpack.c.bf16 %v283_v27, %v282_v26  ;;  %v391_v32 = vld [vmem:[#allocation14 + $0x48] sm:$0xff]  ;;  %v284_v33 = vld [vmem:[#allocation12 + $0x50] sm:$0xff]  ;;  %p1759_p7 = pnand %p1758_p11, %p2027_p5  ;;  %p1765_p2 = scmp.lt.s32.totalorder %s1763_s24, %s1757_s28 }
  0x95   : > { %1213 = vmatprep.mubr.f32.mxu0 %v270_v28  ;;  %v390_v31 = vld [vmem:[#allocation14 + $0x40] sm:$0xff]  ;;  %v285_v34 = vld [vmem:[#allocation12 + $0x58] sm:$0xff]  ;;  %v392_v37 = vld [vmem:[#allocation14 + $0x50] sm:$0xff] }
  0x96   : > { %1404 = vmatpush3.bf16.msra.mxu0 %v1401_v11  ;;  %1434 = vmatpush3.bf16.msra.mxu1 %v2106_v16  ;;  %v2119_v35 = vpack.c.bf16 %v391_v32, %v390_v31  ;;  %v1417_v36 = vpack.c.bf16 %v285_v34, %v284_v33  ;;  %v393_v38 = vld [vmem:[#allocation14 + $0x58] sm:$0xff]  ;;  %v286_v39 = vld [vmem:[#allocation12 + $0x60] sm:$0xff]  ;;  %v287_v40 = vld [vmem:[#allocation12 + $0x68] sm:$0xff]  ;;  %p1760_p13 = pneg %p1759_p7  ;;  %p1766_p4 = por %p1765_p2, %p1764_p1 }
  0x97   : > { %1406 = vmatprep.subr.bf16.mxu0 %v1405_v17  ;;  %1435 = vmatprep.subr.bf16.mxu1 %v1840_v5  ;;  %v2123_v41 = vpack.c.bf16 %v393_v38, %v392_v37  ;;  %v1421_v42 = vpack.c.bf16 %v287_v40, %v286_v39  ;;  %v394_v43 = vld [vmem:[#allocation14 + $0x60] sm:$0xff]  ;;  %v395_v44 = vld [vmem:[#allocation14 + $0x68] sm:$0xff]  ;;  %v288_v45 = vld [vmem:[#allocation12 + $0x70] sm:$0xff] }
  0x98   : > { %v289_v46 = vld [vmem:[#allocation12 + $0x78] sm:$0xff]  ;;  %v2127_v47 = vpack.c.bf16 %v395_v44, %v394_v43  ;;  %v396_v49 = vld [vmem:[#allocation14 + $0x70] sm:$0xff]  ;;  %v271_v52 = vld [vmem:[%s2082_s30 + $0x8] sm:$0xff]  ;;  %p1767_p10 = pnand %p1766_p4, %p1760_p13 }
  0x99   : > { %v1425_v48 = vpack.c.bf16 %v289_v46, %v288_v45  ;;  %v397_v50 = vld [vmem:[#allocation14 + $0x78] sm:$0xff]  ;;  %v379_v53 = vld [vmem:[#allocation2] sm:$0xff]  ;;  %v272_v54 = vld [vmem:[%s2082_s30 + $0x10] sm:$0xff] }
  0x9a   : > { %1408 = vmatpush3.bf16.msra.mxu0 %v1405_v17  ;;  %1437 = vmatpush3.bf16.msra.mxu1 %v2110_v22  ;;  %v2131_v51 = vpack.c.bf16 %v397_v50, %v396_v49  ;;  %v273_v55 = vld [vmem:[%s2082_s30 + $0x18] sm:$0xff]  ;;  %v380_v61 = vld [vmem:[#allocation3] sm:$0xff]  ;;  %v777_v3 = vld [vmem:[#allocation15] sm:$0xff] }
  0x9b   : > { %1410 = vmatprep.subr.bf16.mxu0 %v1409_v23  ;;  %1438 = vmatprep.subr.bf16.mxu1 %v1840_v5  ;;  %v778_v4 = vld [vmem:[#allocation15 + $0x8] sm:$0xff]  ;;  %v780_v15 = vld [vmem:[#allocation15 + $0x18] sm:$0xff]  ;;  %v781_v18 = vld [vmem:[#allocation15 + $0x20] sm:$0xff] }
  0x9c   : > { %v1525_v6 = vpack.c.bf16 %v778_v4, %v777_v3  ;;  %v782_v19 = vld [vmem:[#allocation15 + $0x28] sm:$0xff]  ;;  %v784_v24 = vld [vmem:[#allocation15 + $0x38] sm:$0xff]  ;;  %v785_v27 = vld [vmem:[#allocation15 + $0x40] sm:$0xff] }
  0x9d   : > { %v786_v28 = vld [vmem:[#allocation15 + $0x48] sm:$0xff]  ;;  %v788_v31 = vld [vmem:[#allocation15 + $0x58] sm:$0xff]  ;;  %v789_v33 = vld [vmem:[#allocation15 + $0x60] sm:$0xff] }
  0x9e   : > { %1412 = vmatpush3.bf16.msra.mxu0 %v1409_v23  ;;  %1440 = vmatpush3.bf16.msra.mxu1 %v2115_v29  ;;  %v783_v23 = vld [vmem:[#allocation15 + $0x30] sm:$0xff]  ;;  %v790_v34 = vld [vmem:[#allocation15 + $0x68] sm:$0xff]  ;;  %v792_v37 = vld [vmem:[#allocation15 + $0x78] sm:$0xff] }
  0x9f   : > { %1414 = vmatprep.subr.bf16.mxu0 %v1413_v30  ;;  %1441 = vmatprep.subr.bf16.mxu1 %v1840_v5  ;;  %v1537_v26 = vpack.c.bf16 %v784_v24, %v783_v23  ;;  %v882_v39 = vld [vmem:[#allocation4] sm:$0xff] }
  0xa0   : > { %v884_v40 = vsub.f32 0.0, %v882_v39 }
  0xa2   : > { %1416 = vmatpush3.bf16.msra.mxu0 %v1413_v30  ;;  %1443 = vmatpush3.bf16.msra.mxu1 %v2119_v35  ;;  %v787_v30 = vld [vmem:[#allocation15 + $0x50] sm:$0xff] }
  0xa3   : > { %1418 = vmatprep.subr.bf16.mxu0 %v1417_v36  ;;  %1444 = vmatprep.subr.bf16.mxu1 %v1840_v5  ;;  %v1545_v32 = vpack.c.bf16 %v788_v31, %v787_v30 }
  0xa6   : > { %1420 = vmatpush3.bf16.msra.mxu0 %v1417_v36  ;;  %1446 = vmatpush3.bf16.msra.mxu1 %v2123_v41  ;;  %v791_v36 = vld [vmem:[#allocation15 + $0x70] sm:$0xff] }
  0xa7   : > { %1422 = vmatprep.subr.bf16.mxu0 %v1421_v42  ;;  %1447 = vmatprep.subr.bf16.mxu1 %v1840_v5  ;;  %v1553_v38 = vpack.c.bf16 %v792_v37, %v791_v36 }
  0xaa   : > { %1424 = vmatpush3.bf16.msra.mxu0 %v1421_v42  ;;  %1449 = vmatpush3.bf16.msra.mxu1 %v2127_v47 }
  0xab   : > { %1426 = vmatprep.subr.bf16.mxu0 %v1425_v48  ;;  %1450 = vmatprep.subr.bf16.mxu1 %v1840_v5 }
  0xae   : > { %1428 = vmatpush3.bf16.msra.mxu0 %v1425_v48  ;;  %1452 = vmatpush3.bf16.msra.mxu1 %v2131_v51 }
  0xaf   : > { %1453 = vmatprep.subr.bf16.mxu0 %v1840_v5  ;;  %1477 = vmatprep.subr.bf16.mxu1 %v1840_v5 }
  0xb1   : > { %1214 = vmatmul.mubr.f32.vlgmr.msra.gmra.mrb[0].mxu0 %v271_v52  ;;  %1252 = vmatmul.mubr.f32.vlgmr.msra.gmra.mrb[0].mxu1 %v379_v53 }
  0xb2   : > { %1455 = vmatpush3.bf16.msra.mxu0 %v2103_v10  ;;  %1479 = vmatpush3.bf16.msra.mxu1 %v2103_v10 }
  0xb3   : > { %1456 = vmatprep.subr.bf16.mxu0 %v1840_v5  ;;  %1480 = vmatprep.subr.bf16.mxu1 %v1840_v5 }
  0xb4   : > { %1321 = vmatprep.mubr.msk.f32.mxu1 %vm1841_vm0, %v1842_v9  ;;  %1216 = vmatprep.mubr.f32.mxu0 %v272_v54 }
  0xb5   : > { %1217 = vmatmul.mubr.f32.gmra.mrb[2].mxu0 %v273_v55 }
  0xb6   : > { %1458 = vmatpush3.bf16.msra.mxu0 %v2106_v16  ;;  %1482 = vmatpush3.bf16.msra.mxu1 %v2106_v16 }
  0xb7   : > { %1459 = vmatprep.subr.bf16.mxu0 %v1840_v5  ;;  %1483 = vmatprep.subr.bf16.mxu1 %v1840_v5 }
  0xb8   : > { %1286 = vmatprep.mubr.msk.f32.mxu0 %vm1841_vm0, %v1842_v9 }
  0xba   : > { %1461 = vmatpush3.bf16.msra.mxu0 %v2110_v22  ;;  %1485 = vmatpush3.bf16.msra.mxu1 %v2110_v22 }
  0xbb   : > { %1462 = vmatprep.subr.bf16.mxu0 %v1840_v5  ;;  %1486 = vmatprep.subr.bf16.mxu1 %v1840_v5 }
  0xbe   : > { %1464 = vmatpush3.bf16.msra.mxu0 %v2115_v29  ;;  %1488 = vmatpush3.bf16.msra.mxu1 %v2115_v29 }
  0xbf   : > { %1465 = vmatprep.subr.bf16.mxu0 %v1840_v5  ;;  %1489 = vmatprep.subr.bf16.mxu1 %v1840_v5 }
  0xc2   : > { %1467 = vmatpush3.bf16.msra.mxu0 %v2119_v35  ;;  %1491 = vmatpush3.bf16.msra.mxu1 %v2119_v35 }
  0xc3   : > { %1468 = vmatprep.subr.bf16.mxu0 %v1840_v5  ;;  %1492 = vmatprep.subr.bf16.mxu1 %v1840_v5 }
  0xc6   : > { %1470 = vmatpush3.bf16.msra.mxu0 %v2123_v41  ;;  %1494 = vmatpush3.bf16.msra.mxu1 %v2123_v41 }
  0xc7   : > { %1471 = vmatprep.subr.bf16.mxu0 %v1840_v5  ;;  %1495 = vmatprep.subr.bf16.mxu1 %v1840_v5 }
  0xca   : > { %1473 = vmatpush3.bf16.msra.mxu0 %v2127_v47  ;;  %1497 = vmatpush3.bf16.msra.mxu1 %v2127_v47 }
  0xcb   : > { %1474 = vmatprep.subr.bf16.mxu0 %v1840_v5  ;;  %1498 = vmatprep.subr.bf16.mxu1 %v1840_v5 }
  0xce   : > { %1476 = vmatpush3.bf16.msra.mxu0 %v2131_v51  ;;  %1500 = vmatpush3.bf16.msra.mxu1 %v2131_v51 }
  0xcf   : > { %1501 = vmatprep.subr.bf16.mxu0 %v1840_v5  ;;  %1526 = vmatprep.subr.bf16.mxu1 %v1525_v6 }
 0x184   : > { %v1215_v56 = vpop.f32.mrb[0].mxu0  ;;  %v464_v57 = vpop.f32.mrb[0].mxu1 }
 0x185   : > { %v356_v58 = vpop.f32.mrb[1].mxu0  ;;  %v1253_v59 = vpop.f32.mrb[1].mxu1 }
 0x186   : > { %v468_v60 = vadd.f32 %v464_v57, %v356_v58 }
 0x188   : > { %v469_v62 = vmul.f32 1e-08, %v468_v60  ;;  %v2194_v1 = vpop.f32.mrb[2].mxu0 }
 0x189   : > { %v2196_v2 = vpop.f32.mrb[3].mxu0 }
 0x18a   : > { %v470_v63 = vadd.f32 %v469_v62, %v380_v61 }
 0x18c   : > { %vm471_vm1 = vcmp.ge.f32.partialorder %v470_v63, 2.5e-08 }
 0x18d   : > { %1287 = vmatmul.mubr.msk.f32.vlgmr.msra.gmra.mrb[4].mxu0 %vm471_vm1, %v1843_v0  ;;  %v1052_v7 = vsel %vm471_vm1, 1.0, %v1842_v9 }
 0x18e   : > { %1503 = vmatpush3.bf16.msra.mxu0 %v2103_v10  ;;  %1356 = vmatprep.mubr.msk.f32.mxu0 %vm1841_vm0, %v1842_v9  ;;  %v474_v8 = vmul.f32 2.5e-08, %v1052_v7 }
 0x18f   : > { %1504 = vmatprep.subr.bf16.mxu0 %v1840_v5 }
 0x190   : > { %v475_v13 = vsub.f32 %v470_v63, %v474_v8 }
 0x192   : > { %1506 = vmatpush3.bf16.msra.mxu0 %v2106_v16 }
 0x193   : > { %1507 = vmatprep.subr.bf16.mxu0 %v1840_v5 }
 0x196   : > { %1509 = vmatpush3.bf16.msra.mxu0 %v2110_v22  ;;  %v1533_v22 = vpack.c.bf16 %v782_v19, %v781_v18 }
 0x197   : > { %1510 = vmatprep.subr.bf16.mxu0 %v1840_v5 }
 0x19a   : > { %1512 = vmatpush3.bf16.msra.mxu0 %v2115_v29  ;;  %v1541_v29 = vpack.c.bf16 %v786_v28, %v785_v27 }
 0x19b   : > { %1513 = vmatprep.subr.bf16.mxu0 %v1840_v5 }
 0x19e   : > { %1515 = vmatpush3.bf16.msra.mxu0 %v2119_v35  ;;  %v1549_v35 = vpack.c.bf16 %v790_v34, %v789_v33 }
 0x19f   : > { %1516 = vmatprep.subr.bf16.mxu0 %v1840_v5 }
 0x1a2   : > { %1518 = vmatpush3.bf16.msra.mxu0 %v2123_v41  ;;  %v883_v41 = vld [vmem:[#allocation5] sm:$0xff] }
 0x1a3   : > { %1519 = vmatprep.subr.bf16.mxu0 %v1840_v5  ;;  %v885_v42 = vadd.f32 %v884_v40, %v883_v41 }
 0x1a5   : > { %v886_v43 = vmul.f32 1e-08, %v885_v42 }
 0x1a6   : > { %1521 = vmatpush3.bf16.msra.mxu0 %v2127_v47 }
 0x1a7   : > { %1522 = vmatprep.subr.bf16.mxu0 %v1840_v5  ;;  %v779_v5 = vld [vmem:[#allocation15 + $0x10] sm:$0xff]  ;;  %v887_v44 = vadd.f32 %v886_v43, %v882_v39 }
 0x1a8   : > { %v1529_v17 = vpack.c.bf16 %v780_v15, %v779_v5 }
 0x1a9   : > { %890 = vst [vmem:[%s2096_s23] sm:$0xff] %v887_v44  ;;  %v891_v54 = vsub.f32 0.0, %v887_v44 }
 0x1aa   : > { %1524 = vmatpush3.bf16.msra.mxu0 %v2131_v51 }
 0x260   : > { %v561_v10 = vpop.f32.mrb[4].mxu0 }
 0x261   : > { %v565_v11 = vadd.f32 %v1215_v56, %v561_v10  ;;  %v1288_v12 = vpop.f32.mrb[5].mxu0 }
 0x263   : > { %v566_v14 = vmul.f32 1e-08, %v565_v11 }
 0x265   : > { %v567_v16 = vadd.f32 %v566_v14, %v475_v13 }
 0x267   : > { %vm568_vm2 = vcmp.ge.f32.partialorder %v567_v16, 2.5e-08 }
 0x268   : > { %1322 = vmatmul.mubr.msk.f32.vlgmr.msra.gmra.mrb[2].mxu1 %vm568_vm2, %v1843_v0  ;;  %v1054_v20 = vsel %vm568_vm2, 1.0, %v1842_v9 }
 0x269   : > { %1528 = vmatpush3.bf16.msra.mxu1 %v1525_v6  ;;  %1391 = vmatprep.mubr.msk.f32.mxu1 %vm471_vm1, %v1843_v0  ;;  %v571_v21 = vmul.f32 2.5e-08, %v1054_v20 }
 0x26a   : > { %1530 = vmatprep.subr.bf16.mxu1 %v1529_v17 }
 0x26b   : > { %v572_v25 = vsub.f32 %v567_v16, %v571_v21 }
 0x26d   : > { %1532 = vmatpush3.bf16.msra.mxu1 %v1529_v17 }
 0x26e   : > { %1534 = vmatprep.subr.bf16.mxu1 %v1533_v22 }
 0x271   : > { %1536 = vmatpush3.bf16.msra.mxu1 %v1533_v22 }
 0x272   : > { %1538 = vmatprep.subr.bf16.mxu1 %v1537_v26 }
 0x275   : > { %1540 = vmatpush3.bf16.msra.mxu1 %v1537_v26 }
 0x276   : > { %1542 = vmatprep.subr.bf16.mxu1 %v1541_v29 }
 0x279   : > { %1544 = vmatpush3.bf16.msra.mxu1 %v1541_v29 }
 0x27a   : > { %1546 = vmatprep.subr.bf16.mxu1 %v1545_v32 }
 0x27d   : > { %1548 = vmatpush3.bf16.msra.mxu1 %v1545_v32 }
 0x27e   : > { %1550 = vmatprep.subr.bf16.mxu1 %v1549_v35 }
 0x281   : > { %1552 = vmatpush3.bf16.msra.mxu1 %v1549_v35 }
 0x282   : > { %1554 = vmatprep.subr.bf16.mxu1 %v1553_v38 }
 0x285   : > { %1556 = vmatpush3.bf16.msra.mxu1 %v1553_v38 }
 0x288   : > { %1392 = vmatmul.mubr.msk.f32.vlgmr.msra.gmra.mrb[4].mxu1 %vm568_vm2, %v1843_v0 }
 0x33b   : > { %v659_v45 = vpop.f32.mrb[2].mxu1 }
 0x33c   : > { %v663_v46 = vadd.f32 %v659_v45, %v2196_v2  ;;  %v1323_v47 = vpop.f32.mrb[3].mxu1 }
 0x33e   : > { %v664_v48 = vmul.f32 1e-08, %v663_v46 }
 0x340   : > { %v665_v49 = vadd.f32 %v664_v48, %v572_v25 }
 0x342   : > { %vm666_vm3 = vcmp.ge.f32.partialorder %v665_v49, 2.5e-08 }
 0x343   : > { %1357 = vmatmul.mubr.msk.f32.vlgmr.msra.gmra.mrb[6].mxu0 %vm666_vm3, %v1843_v0  ;;  %1394 = vmatprep.mubr.msk.f32.mxu1 %vm666_vm3, %v1843_v0  ;;  %v1056_v50 = vsel %vm666_vm3, 1.0, %v1842_v9 }
 0x344   : > { %v669_v51 = vmul.f32 2.5e-08, %v1056_v50 }
 0x346   : > { %v670_v52 = vsub.f32 %v665_v49, %v669_v51 }
 0x35b   : > { %v1393_v53 = vpop.f32.mrb[4].mxu1 }
 0x35c   : > { %v859_v55 = vpop.f32.mrb[5].mxu1 }
 0x35d   : > { %v889_v56 = vadd.f32 %v883_v41, %v859_v55 }
 0x35f   : > { %v892_v57 = vadd.f32 %v891_v54, %v889_v56  ;;  %v897_v58 = vadd.f32 %v1393_v53, %v889_v56 }
 0x361   : > { %v893_v59 = vmul.f32 1e-08, %v892_v57 }
 0x363   : > { %v894_v60 = vadd.f32 %v893_v59, %v887_v44 }
 0x365   : > { %1059 = vst [vmem:[%s2096_s23 + $0x8] sm:$0xff] %v894_v60  ;;  %v900_v61 = vsub.f32 0.0, %v894_v60 }
 0x367   : > { %v901_v62 = vadd.f32 %v900_v61, %v897_v58 }
 0x369   : > { %v902_v63 = vmul.f32 1e-08, %v901_v62 }
 0x36b   : > { %v903_v2 = vadd.f32 %v902_v63, %v894_v60 }
 0x36d   : > { %1060 = vst [vmem:[%s2096_s23 + $0x10] sm:$0xff] %v903_v2 }
 0x416   : > { %v757_v3 = vpop.f32.mrb[6].mxu0 }
 0x417   : > { %v761_v4 = vadd.f32 %v2194_v1, %v757_v3  ;;  %v1358_v6 = vpop.f32.mrb[7].mxu0  ;;  %v909_v1 = vsub.f32 0.0, %v903_v2 }
 0x419   : > { %v762_v7 = vmul.f32 1e-08, %v761_v4 }
 0x41b   : > { %v763_v8 = vadd.f32 %v762_v7, %v670_v52 }
 0x41d   : > { %vm764_vm4 = vcmp.ge.f32.partialorder %v763_v8, 2.5e-08 }
 0x41e   : > { %v1058_v10 = vsel %vm764_vm4, 1.0, %v1842_v9  ;;  %1395 = vmatmul.mubr.msk.f32.gmra.mrb[6].mxu1 %vm764_vm4, %v1843_v0 }
 0x41f   : > { %v767_v11 = vmul.f32 2.5e-08, %v1058_v10  ;;  %771 = vst [vmem:[#allocation2] sm:$0xff] %v1058_v10 }
 0x421   : > { %v768_v12 = vsub.f32 %v763_v8, %v767_v11 }
 0x423   : > { %772 = vst [vmem:[#allocation3] sm:$0xff] %v768_v12 }
 0x4f1   : > { %v1396_v13 = vpop.f32.mrb[6].mxu1 }
 0x4f2   : > { %v869_v14 = vpop.f32.mrb[7].mxu1 }
 0x4f3   : > { %v906_v5 = vadd.f32 %v897_v58, %v869_v14 }
 0x4f5   : > { %v910_v15 = vadd.f32 %v909_v1, %v906_v5  ;;  %v915_v16 = vadd.f32 %v1396_v13, %v906_v5 }
 0x4f7   : > { %v911_v17 = vmul.f32 1e-08, %v910_v15  ;;  %919 = vst [vmem:[#allocation5] sm:$0xff] %v915_v16 }
 0x4f9   : > { %v912_v9 = vadd.f32 %v911_v17, %v903_v2 }
 0x4fb   : > { %1061 = vst [vmem:[%s2096_s23 + $0x18] sm:$0xff] %v912_v9  ;;  %918 = vst [vmem:[#allocation4] sm:$0xff] %v912_v9 }
 0x4fc   : > { %1770 = shalt.err (!%p1767_p10)
}
 0x4fd   : > { %s1771_s5 = scalar_lea.hbm %s2223_s8, 512  ;;  %s1775_s25 = scalar_lea.hbm %s2274_s4, 1024 }
 0x4fe   : > { %p1772_p3 = scmp.ne.s32.totalorder %s2223_s8, %s1771_s5  ;;  %p1776_p0 = scmp.lt.u32.totalorder %s2223_s8, %s2274_s4 }
 0x4ff   : > { %p1777_p6 = scmp.lt.u32.totalorder %s1775_s25, %s1771_s5  ;;  %p1779_p11 = scmp.lt.u32.totalorder %s1771_s5, %s2223_s8 }
 0x500   : > { %p1773_p12 = pnand %p1772_p3, %p2027_p5 }
 0x501   : > { %p1778_p8 = por %p1777_p6, %p1776_p0 }
 0x502   : > { %p1774_p9 = pneg %p1773_p12 }
 0x503   : > { %p1780_p7 = por %p1779_p11, %p1778_p8 }
 0x505   : > { %p1781_p13 = pnand %p1780_p7, %p1774_p9 }
 0x507   : > { %1784 = shalt.err (!%p1781_p13)
}
 0x508   : > { %s1845_s23 = smov 128   ;;  %s1846_s21 = smov 8  }
 0x509   : > { %1571 = dma.vmem_to_hbm [thread:$0]  (%p2027_p5), %s2225_s14, 512, %s2223_s8, %s921_s9, %s1845_s23, %s1845_s23, %s1846_s21  }
 0x50a PF: > { %s949_s20 = sand.u32 1, %s1819_s15   ;;  %p2293_p1 = scmp.ne.s32.totalorder %s2279_s22, 0 }
 0x50b   : > { %p2294_p2 = scmp.ge.s32.totalorder %s1831_s18, 2  ;;  %s950_s6 = scalar_lea.sflag [#allocation11], %s949_s20 }
 0x50d   : > { %p1588_p4 = pnand %p2294_p2, %p2293_p1 }
 0x50f   : > { %1814 = dma.done.wait (!%p1588_p4), %s950_s6, 512  }
 0x510   : > { %1816 = vsyncadd (!%p1588_p4), %s950_s6, 4294966784  ;;  %p19_p10 = scmp.ge.s32.totalorder %s2013_s10, 4   ;;  %s2295_s15 = smov %s1823_s16 }
 0x511   : > { %s2296_s16 = smov %s1827_s17  ;;  %s2297_s17 = smov %s2023_s12 }
 0x512   : > { %s2298_s18 = smov %s2013_s10  ;;  %21 = sbr.rel (!%p19_p10) target bundleno = 7 (0x7), region = 109 }
 0x519   :  { %955 = vsyncpa [#allocation10], 1 }
 0x51a   :  { %957 = vsyncpa [#allocation10 + $0x1], 1 }
 0x51b   :  { %958 = vsyncpa [#allocation13], 1 }
 0x51c   :  { %959 = vsyncpa [#allocation16], 1 }
 0x51d   :  { %960 = vsyncpa [#allocation11], 1 }
 0x51e   :  { %962 = vsyncpa [#allocation11 + $0x1], 1 }

</bundles_post_ra>
